<compile_context>
chip_gen: v7x
topology: tpu7x:2x2x1
jax: 0.10.0
libtpu: 0.0.40
codegen_flags: <defaults>
</compile_context>

<pallas_src>
import functools

import jax
import jax.numpy as jnp
from jax.experimental import pallas as pl
from jax.experimental.pallas import tpu as pltpu


def _round_up(x: int, m: int) -> int:
    return ((x + m - 1) // m) * m


def _choose_kn_tiles(K: int, N: int):
    # tk: take the whole (padded) K in one step when it fits under the cap;
    # fewer K steps = fewer accumulator RMWs (matters most on v5e's 1 vst slot).
    tk = min(2048, _round_up(K, 128))
    # tn: lane-dense output, capped so the weight tile stays a few MiB and, for
    # large N, there are >= 2 N blocks to feed both v7x TensorCores.
    tn = min(512, _round_up(N, 128))
    return tk, tn


def _choose_tm(B: int) -> int:
    return min(256, _round_up(B, 8))


def _linear_kernel(x_ref, w_ref, b_ref, o_ref):
    # x_ref : (tm, tk)  bf16   activation tile
    # w_ref : (tk, tn)  bf16   weight tile, pre-transposed (K, N) layout
    # b_ref : (1,  tn)  f32    bias tile
    # o_ref : (tm, tn)  f32    output tile; block index is k-invariant, so it
    #                          stays VMEM-resident across the K axis and doubles
    #                          as the accumulator.
    k = pl.program_id(2)

    @pl.when(k == 0)
    def _init():
        o_ref[...] = jnp.zeros_like(o_ref)

    # Standard (K on sublanes of RHS) contraction: bf16 in, f32 MXU accumulate.
    o_ref[...] += jnp.dot(x_ref[...], w_ref[...],
                          preferred_element_type=jnp.float32)

    @pl.when(k == pl.num_programs(2) - 1)
    def _finalize():
        o_ref[...] = o_ref[...] + b_ref[...]


def prepare_linear_params(weight, bias):
    """One-time parameter prep, hoisted out of the forward path.

    weight: (num_output, num_input) f32  (PyTorch nn.Linear layout)
    bias:   (num_output,) f32
    returns (w_kn, b_p):
      w_kn: (K_pad, N_pad) bf16  -- transposed + padded weight
      b_p : (1, N_pad)     f32   -- padded bias row
    """
    N, K = weight.shape
    tk, tn = _choose_kn_tiles(K, N)
    K_pad = _round_up(K, tk)
    N_pad = _round_up(N, tn)
    w_kn = weight.astype(jnp.bfloat16).T          # (K, N)
    if K_pad != K or N_pad != N:
        w_kn = jnp.pad(w_kn, ((0, K_pad - K), (0, N_pad - N)))
    b_p = bias.astype(jnp.float32)
    if N_pad != N:
        b_p = jnp.pad(b_p, (0, N_pad - N))
    return w_kn, b_p.reshape(1, N_pad)


@functools.partial(jax.jit, static_argnames=("num_output",))
def linear_net_forward(x, w_kn, b_p, *, num_output):
    """Forward pass of LinearNet.

    x:     (B, C, H, W) or (B, num_input) -- flattened to (B, num_input)
    w_kn:  (K_pad, N_pad) bf16            -- from prepare_linear_params
    b_p:   (1, N_pad) f32                 -- from prepare_linear_params
    returns (B, num_output) float32
    """
    B = x.shape[0]
    x2d = x.reshape(B, -1)                        # like torch .view(B, -1)
    K = x2d.shape[1]
    K_pad, N_pad = w_kn.shape

    tk, tn = _choose_kn_tiles(K, num_output)
    tm = _choose_tm(B)
    M_pad = _round_up(B, tm)

    # Cast before padding (half the pad bytes); skip no-op pads entirely.
    xb = x2d.astype(jnp.bfloat16)
    if M_pad != B or K_pad != K:
        xb = jnp.pad(xb, ((0, M_pad - B), (0, K_pad - K)))

    grid = (M_pad // tm, N_pad // tn, K_pad // tk)   # reduction axis last

    out = pl.pallas_call(
        _linear_kernel,
        out_shape=jax.ShapeDtypeStruct((M_pad, N_pad), jnp.float32),
        grid_spec=pltpu.PrefetchScalarGridSpec(
            num_scalar_prefetch=0,
            grid=grid,
            in_specs=[
                pl.BlockSpec((tm, tk), lambda i, j, k: (i, k)),   # x
                pl.BlockSpec((tk, tn), lambda i, j, k: (k, j)),   # W, (K, N) layout
                pl.BlockSpec((1, tn), lambda i, j, k: (0, j)),    # bias
            ],
            out_specs=pl.BlockSpec((tm, tn), lambda i, j, k: (i, j)),
        ),
        compiler_params=pltpu.CompilerParams(
            dimension_semantics=("parallel", "parallel", "arbitrary"),
            vmem_limit_bytes=48 * 1024 * 1024,   # safe on v7x (64 MiB phys), ample on v5e/v6e
        ),
    )(xb, w_kn, b_p)

    if M_pad != B or N_pad != num_output:
        out = out[:B, :num_output]
    return out


if __name__ == "__main__":
    # Small shapes consistent with the module: x (B, C, H, W) flattened to
    # num_input = C*H*W; Linear(num_input -> num_output).
    B, C, H, W = 8, 4, 8, 8            # num_input = 4*8*8 = 256
    num_input = C * H * W
    num_output = 128

    key = jax.random.PRNGKey(0)
    kx, kw, kb = jax.random.split(key, 3)

    # Deterministic parameter init (uniform, torch-Linear-like bound 1/sqrt(fan_in)).
    bound = 1.0 / (num_input ** 0.5)
    weight = jax.random.uniform(kw, (num_output, num_input), jnp.float32, -bound, bound)
    bias = jax.random.uniform(kb, (num_output,), jnp.float32, -bound, bound)
    x = jax.random.normal(kx, (B, C, H, W), jnp.float32)

    # One-time parameter prep (bf16 cast + (K, N) transpose + padding),
    # hoisted out of the per-call forward path.
    w_kn, b_p = prepare_linear_params(weight, bias)
    w_kn, b_p = jax.block_until_ready((w_kn, b_p))

    y = linear_net_forward(x, w_kn, b_p, num_output=num_output)
    jax.block_until_ready(y)

    # Reference check in plain JAX (f32).  bf16 inputs -> loosened tolerance.
    y_ref = x.reshape(B, -1) @ weight.T + bias
    assert y.shape == (B, num_output)
    max_err = float(jnp.max(jnp.abs(y - y_ref)))
    assert jnp.allclose(y, y_ref, atol=3e-2, rtol=3e-2), f"max abs err {max_err}"

    print("KERNEL_OK")
</pallas_src>

<mosaic_0001>
module attributes {stable_mosaic.version = 11 : i64} {
  func.func @_linear_kernel(%arg0: i32, %arg1: i32, %arg2: i32, %arg3: memref<8x256xbf16, #tpu.memory_space<vmem>>, %arg4: memref<256x128xbf16, #tpu.memory_space<vmem>>, %arg5: memref<1x128xf32, #tpu.memory_space<vmem>>, %arg6: memref<8x128xf32, #tpu.memory_space<vmem>>) attributes {dimension_semantics = [#tpu.dimension_semantics<parallel>, #tpu.dimension_semantics<parallel>, #tpu.dimension_semantics<arbitrary>], iteration_bounds = array<i64: 1, 1, 1>, scalar_prefetch = 0 : i64, scratch_operands = 0 : i64, tpu.core_type = #tpu.core_type<tc>, window_params = [{transform_indices = @transform_0, window_bounds = array<i64: 8, 256>}, {transform_indices = @transform_1, window_bounds = array<i64: 256, 128>}, {transform_indices = @transform_2, window_bounds = array<i64: 1, 128>}, {transform_indices = @transform_3, window_bounds = array<i64: 8, 128>}]} {
    %c0_i32 = arith.constant 0 : i32
    %0 = arith.cmpi eq, %arg2, %c0_i32 : i32
    %1 = arith.extui %0 : i1 to i32
    %c0_i32_0 = arith.constant 0 : i32
    %2 = arith.cmpi ne, %1, %c0_i32_0 : i32
    scf.if %2 {
      %cst_10 = arith.constant 0.000000e+00 : f32
      %12 = vector.broadcast %cst_10 : f32 to vector<8x128xf32>
      %c0_11 = arith.constant 0 : index
      %c0_12 = arith.constant 0 : index
      %13 = vector.load %arg6[%c0_11, %c0_12] : memref<8x128xf32, #tpu.memory_space<vmem>>, vector<8x128xf32>
      tpu.vector_store %arg6[%c0_11, %c0_12], %12 {strides = array<i32>} : memref<8x128xf32, #tpu.memory_space<vmem>>, vector<8x128xf32>,
    } else {
    }
    %c0 = arith.constant 0 : index
    %c0_1 = arith.constant 0 : index
    %3 = vector.load %arg6[%c0, %c0_1] : memref<8x128xf32, #tpu.memory_space<vmem>>, vector<8x128xf32>
    %c0_2 = arith.constant 0 : index
    %c0_3 = arith.constant 0 : index
    %4 = vector.load %arg3[%c0_2, %c0_3] : memref<8x256xbf16, #tpu.memory_space<vmem>>, vector<8x256xbf16>
    %c0_4 = arith.constant 0 : index
    %c0_5 = arith.constant 0 : index
    %5 = vector.load %arg4[%c0_4, %c0_5] : memref<256x128xbf16, #tpu.memory_space<vmem>>, vector<256x128xbf16>
    %cst = arith.constant dense<0.000000e+00> : vector<8x128xf32>
    %6 = tpu.matmul %4, %5, %cst {dimension_numbers = #tpu.dot_dimension_numbers<[1], [0], [0], [1], [0, 0, 1, 1], [], []>} : vector<8x256xbf16>, vector<256x128xbf16>, vector<8x128xf32> -> vector<8x128xf32>
    %7 = arith.addf %3, %6 : vector<8x128xf32>
    %c0_6 = arith.constant 0 : index
    %c0_7 = arith.constant 0 : index
    %8 = vector.load %arg6[%c0_6, %c0_7] : memref<8x128xf32, #tpu.memory_space<vmem>>, vector<8x128xf32>
    tpu.vector_store %arg6[%c0_6, %c0_7], %7 {strides = array<i32>} : memref<8x128xf32, #tpu.memory_space<vmem>>, vector<8x128xf32>,
    %c0_i32_8 = arith.constant 0 : i32
    %9 = arith.cmpi eq, %arg2, %c0_i32_8 : i32
    %10 = arith.extui %9 : i1 to i32
    %c0_i32_9 = arith.constant 0 : i32
    %11 = arith.cmpi ne, %10, %c0_i32_9 : i32
    scf.if %11 {
      %c0_10 = arith.constant 0 : index
      %c0_11 = arith.constant 0 : index
      %12 = vector.load %arg6[%c0_10, %c0_11] : memref<8x128xf32, #tpu.memory_space<vmem>>, vector<8x128xf32>
      %c0_12 = arith.constant 0 : index
      %c0_13 = arith.constant 0 : index
      %13 = vector.load %arg5[%c0_12, %c0_13] : memref<1x128xf32, #tpu.memory_space<vmem>>, vector<1x128xf32>
      %14 = vector.broadcast %13 : vector<1x128xf32> to vector<8x128xf32>
      %15 = arith.addf %12, %14 : vector<8x128xf32>
      %c0_14 = arith.constant 0 : index
      %c0_15 = arith.constant 0 : index
      %16 = vector.load %arg6[%c0_14, %c0_15] : memref<8x128xf32, #tpu.memory_space<vmem>>, vector<8x128xf32>
      tpu.vector_store %arg6[%c0_14, %c0_15], %15 {strides = array<i32>} : memref<8x128xf32, #tpu.memory_space<vmem>>, vector<8x128xf32>,
    } else {
    }
    return
  }
  func.func @transform_0(%arg0: i32, %arg1: i32, %arg2: i32) -> (i32, i32) {
    %c0_i32 = arith.constant 0 : i32
    return %arg0, %arg2 : i32, i32
  }
  func.func @transform_1(%arg0: i32, %arg1: i32, %arg2: i32) -> (i32, i32) {
    %c0_i32 = arith.constant 0 : i32
    return %arg2, %arg1 : i32, i32
  }
  func.func @transform_2(%arg0: i32, %arg1: i32, %arg2: i32) -> (i32, i32) {
    %c0_i32 = arith.constant 0 : i32
    %c0_i32_0 = arith.constant 0 : i32
    return %c0_i32, %arg1 : i32, i32
  }
  func.func @transform_3(%arg0: i32, %arg1: i32, %arg2: i32) -> (i32, i32) {
    %c0_i32 = arith.constant 0 : i32
    return %arg0, %arg1 : i32, i32
  }
}

</mosaic_0001>

<bundles_post_ra>
// kernel: linear_net_forward.1
= control target key start
LH: loop header
LB: loop body
LE: loop exit
PB: predicated region body
PF: predicated region fallthrough
CT: control target
= control target key end

     0   :  { %s399_s0 = inlined_call_operand.vmem [shape: bf16[8,256], index: 0, kind: input, shape index: {}]   ;;  %s400_s1 = inlined_call_operand.vmem [shape: bf16[256,128], index: 1, kind: input, shape index: {}]   ;;  %s401_s2 = inlined_call_operand.vmem [shape: f32[1,128], index: 2, kind: input, shape index: {}]   ;;  %s402_s3 = inlined_call_operand.hbm [shape: f32[8,128], index: 3, kind: output, shape index: {}]  }
   0x1   :  { %v270_v0 = vld [vmem:[%s400_s1 + $0x40] sm:$0xff]   ;;  %v272_v2 = vld [vmem:[%s400_s1 + $0x48] sm:$0xff]   ;;  %v274_v4 = vld [vmem:[%s400_s1 + $0x50] sm:$0xff]  }
   0x2   :  { %v271_v1 = vld [vmem:[%s400_s1] sm:$0xff]   ;;  %246 = vmatprep.subr.bf16.mxu0 %v270_v0  ;;  %v273_v3 = vld [vmem:[%s400_s1 + $0x8] sm:$0xff]   ;;  %v275_v5 = vld [vmem:[%s400_s1 + $0x10] sm:$0xff]  }
   0x3   :  { %247 = vmatpush3.bf16.msra.mxu0 %v271_v1  ;;  %v276_v6 = vld [vmem:[%s400_s1 + $0x58] sm:$0xff]   ;;  %v278_v8 = vld [vmem:[%s400_s1 + $0x60] sm:$0xff]   ;;  %v280_v10 = vld [vmem:[%s400_s1 + $0x68] sm:$0xff]  }
   0x4   :  { %248 = vmatprep.subr.bf16.mxu0 %v272_v2  ;;  %v277_v7 = vld [vmem:[%s400_s1 + $0x18] sm:$0xff]   ;;  %v279_v9 = vld [vmem:[%s400_s1 + $0x20] sm:$0xff]  }
   0x5   :  { %v22_v11 = vld [vmem:[%s399_s0] sm:$0xff] }
   0x7   :  { %249 = vmatpush3.bf16.msra.mxu0 %v273_v3 }
   0x8   :  { %250 = vmatprep.subr.bf16.mxu0 %v274_v4 }
   0xb   :  { %251 = vmatpush3.bf16.msra.mxu0 %v275_v5 }
   0xc   :  { %252 = vmatprep.subr.bf16.mxu0 %v276_v6 }
   0xf   :  { %253 = vmatpush3.bf16.msra.mxu0 %v277_v7 }
  0x10   :  { %254 = vmatprep.subr.bf16.mxu0 %v278_v8 }
  0x11   :  { %8 = vsyncpa [#allocation3], 0  ;;  %v228_v12 = vcombine.high %v22_v11, %v22_v11  ;;  %v281_v13 = vld [vmem:[%s400_s1 + $0x28] sm:$0xff]   ;;  %v282_v14 = vld [vmem:[%s400_s1 + $0x70] sm:$0xff]   ;;  %v227_v18 = vcombine.low %v22_v11, %v22_v11  ;;  %s312_s20 = smov [#allocation2]  }
  0x12   :  { %v283_v15 = vld [vmem:[%s400_s1 + $0x30] sm:$0xff]   ;;  %v284_v16 = vld [vmem:[%s400_s1 + $0x78] sm:$0xff]   ;;  %v245_v24 = vld [vmem:[%s401_s2] ss:$0 sm:$0xff]  ;;  %s219_s21 = sshll.u32 %s312_s20, 4  ;;  %s220_s21 = int_to_ptr.vmem [resolvable:$true] %s219_s21 }
  0x13   :  { %255 = vmatpush3.bf16.msra.mxu0 %v279_v9  ;;  %190 = vmatprep.mubr.bf16.mxu0 %v228_v12  ;;  %v285_v17 = vld [vmem:[%s400_s1 + $0x38] sm:$0xff]   ;;  %s288_s22 = scalar_lea.vmem %s220_s21, 128  ;;  %p293_p1 = scmp.lt.s32.totalorder %s220_s21, %s220_s21 }
  0x14   :  { %256 = vmatprep.subr.bf16.mxu0 %v280_v10  ;;  %p289_p0 = scmp.ne.s32.totalorder %s220_s21, %s288_s22  ;;  %p294_p2 = scmp.lt.s32.totalorder %s288_s22, %s288_s22 }
  0x16   :  { %p295_p3 = por %p294_p2, %p293_p1 }
  0x17   :  { %257 = vmatpush3.bf16.msra.mxu0 %v281_v13 }
  0x18   :  { %258 = vmatprep.subr.bf16.mxu0 %v282_v14  ;;  %p296_p4 = pnand %p295_p3, %p289_p0 }
  0x1b   :  { %259 = vmatpush3.bf16.msra.mxu0 %v283_v15 }
  0x1c   :  { %260 = vmatprep.subr.bf16.mxu0 %v284_v16 }
  0x1f   :  { %261 = vmatpush3.bf16.msra.mxu0 %v285_v17 }
  0x22   :  { %191 = vmatmul.mubr.bf16.vlgmr.msra.gmra.mrb[0].mxu0 %v227_v18 }
  0xf5   :  { %v262_v19 = vpop.f32.mrb[0].mxu0 }
  0xf6   :  { %v263_v20 = vpop.f32.mrb[1].mxu0 }
  0xf7   :  { %v264_v21 = vadd.f32 %v263_v20, %v262_v19  ;;  %v265_v22 = vpop.f32.mrb[2].mxu0 }
  0xf8   :  { %v266_v23 = vpop.f32.mrb[3].mxu0 }
  0xf9   :  { %v211_v25 = vadd.f32 %v264_v21, %v245_v24 }
  0xfb   :  { %212 = vst [vmem:[#allocation2] sm:$0xff] %v211_v25 }
  0xfc   :  { %299 = shalt.err (!%p296_p4)
}
  0xfd   :  { %s300_s24 = scalar_lea.hbm %s402_s3, 128 }
  0xfe   :  { %p301_p5 = scmp.ne.s32.totalorder %s402_s3, %s300_s24  ;;  %p304_p6 = scmp.lt.u32.totalorder %s300_s24, %s402_s3 }
 0x100   :  { %p306_p7 = pnand %p304_p6, %p301_p5 }
 0x102   :  { %309 = shalt.err (!%p306_p7)
}
 0x103   :  { %222 = dma.vmem_to_hbm [thread:$0]  %s220_s21, 128, %s402_s3, [#allocation3]  }
 0x104   :  { %310 = dma.done.wait [#allocation3], 128  }
 0x105   :  { %311 = vsyncadd [#allocation3], 4294967168 }
 0x106   :  { %226 = vsyncpa [#allocation3], 1 }

</bundles_post_ra>
